<compile_context>
chip_gen: v7x
topology: tpu7x:2x2x1
jax: 0.10.0
libtpu: 0.0.40
codegen_flags: <defaults>
</compile_context>

<pallas_src>
import jax
import jax.numpy as jnp
import numpy as np
from jax.experimental import pallas as pl
from jax.experimental.pallas import tpu as pltpu

CH_CNN = 128
CH_FC = 128
KSIZE = 4
SEQ = 8
N_CH = 8
IN_FLAT = N_CH * SEQ                              # 64 (flattened NCL lanes)
N_CONV_OUT = SEQ - KSIZE + 1                      # 5
N_SCALAR_FC = 5
CONV_BLK = CH_CNN * N_CONV_OUT                    # 640
CONV_COLS = 2 * CONV_BLK                          # 1280
INCOMING = CONV_COLS + N_SCALAR_FC * CH_FC        # 1920


def _round_up(n, m):
    return ((n + m - 1) // m) * m


# ----------------------------------------------------------------------------
# Kernel: conv MXU push + VPU scalar branches + split-K fc1 + fc3 + softmax.
# ----------------------------------------------------------------------------
def mactor_kernel(x_ref, wconv_ref, bconv_ref, wfc_ref, bfc_ref,
                  w1c_ref, w1s_ref, b1_ref, w3_ref, b3_ref, out_ref):
    x = x_ref[...]                                           # [TB, 64] f32
    xb = x.astype(wconv_ref.dtype)                           # bf16 for the MXU

    # Both conv branches (BN folded into banded weights): one MXU push.
    conv = jnp.maximum(
        jnp.dot(xb, wconv_ref[...], preferred_element_type=jnp.float32)
        + bconv_ref[...], 0.0)                               # [TB, 1280] f32

    # Five scalar-FC branches on the VPU (kept in f32; off the MXU).
    hs = []
    for k in range(N_SCALAR_FC):
        lane = (3 + k) * SEQ + (SEQ - 1)                     # x[:, 3+k, -1]
        s_k = x[:, lane:lane + 1]                            # [TB, 1] f32
        hs.append(jnp.maximum(s_k * wfc_ref[k:k + 1, :] + bfc_ref[k:k + 1, :],
                              0.0))                          # [TB, 128] f32
    sfeat = jnp.concatenate(hs, axis=-1).astype(w1s_ref.dtype)  # [TB, 640] bf16

    # fc1: split-K contraction over the conv (1280) + scalar (640) feature blocks.
    h = jnp.maximum(
        jnp.dot(conv.astype(w1c_ref.dtype), w1c_ref[...],
                preferred_element_type=jnp.float32)
        + jnp.dot(sfeat, w1s_ref[...], preferred_element_type=jnp.float32)
        + b1_ref[...], 0.0)                                  # [TB, 128] f32

    # fc3 + softmax over the action dimension (exact divide: denom is [TB,1],
    # so the approximate EUP reciprocal saves nothing and breaks sum-to-1).
    logits = jnp.dot(h.astype(w3_ref.dtype), w3_ref[...],
                     preferred_element_type=jnp.float32) + b3_ref[...]
    m = jnp.max(logits, axis=-1, keepdims=True)
    e = jnp.exp(logits - m)
    out_ref[...] = e / jnp.sum(e, axis=-1, keepdims=True)


# ----------------------------------------------------------------------------
# One-time (host-side) weight folding: BN fold + conv Toeplitz + fc1 permute.
# Call this once per parameter set and reuse the result across forward calls.
# ----------------------------------------------------------------------------
def build_fused_weights(params):
    p = {k: np.asarray(v, np.float32) for k, v in params.items()}
    eps = 1e-5
    scale = p["bn_w"][0] / np.sqrt(p["bn_rv"][0] + eps)
    shift = p["bn_b"][0] - p["bn_rm"][0] * scale

    def toeplitz(cw):      # cw [Cout, K] -> [SEQ, 5*128], time-major columns
        w = np.zeros((SEQ, N_CONV_OUT, CH_CNN), np.float32)
        for t in range(N_CONV_OUT):
            w[t:t + KSIZE, t, :] = cw.T                      # [K, Cout]
        return w.reshape(SEQ, CONV_BLK)

    c1 = p["conv1_w"][:, 0, :]                               # [128, 4]
    c2 = p["conv2_w"][:, 0, :]

    # Fused conv weight over the flattened [B, 64] NCL input (row = c*SEQ + t).
    wconv = np.zeros((IN_FLAT, CONV_COLS), np.float32)
    wconv[0:SEQ, 0:CONV_BLK] = scale * toeplitz(c1)          # channel 0 -> conv1
    wconv[SEQ:2 * SEQ, CONV_BLK:CONV_COLS] = scale * toeplitz(c2)   # ch 1 -> conv2

    # Conv bias with the BN shift folded in (per-channel, tiled time-major).
    b1c = p["conv1_b"] + shift * c1.sum(axis=1)
    b2c = p["conv2_b"] + shift * c2.sum(axis=1)
    bconv = np.concatenate([np.tile(b1c, N_CONV_OUT),
                            np.tile(b2c, N_CONV_OUT)])[None, :]     # [1, 1280]

    # Scalar-FC weights/biases for the in-kernel VPU path.
    wfc = np.stack([p[f"fc_{k}_w"][:, 0] for k in range(N_SCALAR_FC)])  # [5,128]
    bfc = np.stack([p[f"fc_{k}_b"] for k in range(N_SCALAR_FC)])        # [5,128]

    # fc1 weight: re-index the conv sections from PyTorch's channel-major
    # flatten (c*5+t) to the kernel's time-major layout (t*128+c).
    WT = p["fc1_w"].T                                        # [1920, 128]

    def perm(blk):
        return blk.reshape(CH_CNN, N_CONV_OUT, CH_FC).transpose(1, 0, 2) \
                  .reshape(CONV_BLK, CH_FC)

    w1c = np.concatenate([perm(WT[:CONV_BLK]),
                          perm(WT[CONV_BLK:CONV_COLS])], axis=0)     # [1280, 128]
    w1s = WT[CONV_COLS:]                                             # [640, 128]

    bf16 = jnp.bfloat16
    return dict(
        wconv=jnp.asarray(wconv, bf16),
        bconv=jnp.asarray(bconv, jnp.float32),
        wfc=jnp.asarray(wfc, jnp.float32),
        bfc=jnp.asarray(bfc, jnp.float32),
        w1c=jnp.asarray(w1c, bf16),
        w1s=jnp.asarray(w1s, bf16),
        b1=jnp.asarray(p["fc1_b"][None, :], jnp.float32),
        w3=jnp.asarray(p["fc3_w"].T, bf16),
        b3=jnp.asarray(p["fc3_b"][None, :], jnp.float32),
    )


def mactor_forward(fused, x):
    """x: f32[B, 8, 8] (NCL).  Returns softmax action probs f32[B, action_space]."""
    B = x.shape[0]
    A = fused["w3"].shape[1]

    # Reshape-only view of the NCL input (stays f32; cast happens in-kernel).
    x_flat = x.reshape(B, IN_FLAT)

    # Batch tiling: up to 1024 rows/tile; for non-tiny batches size the tile so
    # the grid has >= 2 steps (both v7x TensorCores get work on the "parallel"
    # axis).  Small batches pad to one multiple-of-8 tile.
    B8 = _round_up(B, 8)
    if B8 <= 8:
        TB = 8
    else:
        TB = min(1024, _round_up((B8 + 1) // 2, 8))
    padded_B = _round_up(B8, TB)
    if padded_B != B:
        x_flat = jnp.pad(x_flat, ((0, padded_B - B), (0, 0)))

    const = lambda i: (0, 0)   # weights: constant block index -> fetched once
    out = pl.pallas_call(
        mactor_kernel,
        out_shape=jax.ShapeDtypeStruct((padded_B, A), jnp.float32),
        grid=(padded_B // TB,),
        in_specs=[
            pl.BlockSpec((TB, IN_FLAT), lambda i: (i, 0)),
            pl.BlockSpec((IN_FLAT, CONV_COLS), const),
            pl.BlockSpec((1, CONV_COLS), const),
            pl.BlockSpec((N_SCALAR_FC, CH_FC), const),
            pl.BlockSpec((N_SCALAR_FC, CH_FC), const),
            pl.BlockSpec((CONV_COLS, CH_FC), const),
            pl.BlockSpec((N_SCALAR_FC * CH_FC, CH_FC), const),
            pl.BlockSpec((1, CH_FC), const),
            pl.BlockSpec((CH_FC, A), const),
            pl.BlockSpec((1, A), const),
        ],
        out_specs=pl.BlockSpec((TB, A), lambda i: (i, 0)),
        compiler_params=pltpu.CompilerParams(
            dimension_semantics=("parallel",),
            vmem_limit_bytes=32 * 1024 * 1024),
    )(x_flat, fused["wconv"], fused["bconv"], fused["wfc"], fused["bfc"],
      fused["w1c"], fused["w1s"], fused["b1"], fused["w3"], fused["b3"])
    return out[:B]


# ----------------------------------------------------------------------------
# Pure-JAX reference (f32, exact precision) for verification.
# ----------------------------------------------------------------------------
def mactor_reference(params, x):
    eps = 1e-5
    hp = jax.lax.Precision.HIGHEST
    scale = params["bn_w"] / jnp.sqrt(params["bn_rv"] + eps)    # [1]
    shift = params["bn_b"] - params["bn_rm"] * scale
    rates = x[:, 0:1, :] * scale[None, :, None] + shift[None, :, None]
    bw = x[:, 1:2, :] * scale[None, :, None] + shift[None, :, None]

    def conv1d(inp, w, b):                                      # inp [B,1,L], w [Cout,1,K]
        patches = jnp.stack([inp[:, 0, t:t + KSIZE] for t in range(N_CONV_OUT)],
                            axis=1)                             # [B, 5, 4]
        return jnp.einsum("btk,ck->bct", patches, w[:, 0, :],
                          precision=hp) + b[None, :, None]

    x1 = jax.nn.relu(conv1d(rates, params["conv1_w"], params["conv1_b"]))  # [B,128,5]
    x2 = jax.nn.relu(conv1d(bw, params["conv2_w"], params["conv2_b"]))
    feats = [x1.reshape(x1.shape[0], -1), x2.reshape(x2.shape[0], -1)]
    for k in range(N_SCALAR_FC):
        s = x[:, 3 + k, -1:]                                    # [B, 1]
        feats.append(jax.nn.relu(
            jnp.dot(s, params[f"fc_{k}_w"].T, precision=hp) + params[f"fc_{k}_b"]))
    cat = jnp.concatenate(feats, axis=1)                        # [B, 1920]
    h = jax.nn.relu(jnp.dot(cat, params["fc1_w"].T, precision=hp) + params["fc1_b"])
    logits = jnp.dot(h, params["fc3_w"].T, precision=hp) + params["fc3_b"]
    return jax.nn.softmax(logits, axis=1)


def init_params(key, action_space):
    keys = jax.random.split(key, 24)
    it = iter(keys)

    def rnd(shape, s=0.1):
        return jax.random.normal(next(it), shape, jnp.float32) * s

    p = {
        # BatchNorm1d(1): affine params + running stats (eval mode).
        "bn_w": 1.0 + rnd((1,), 0.1),
        "bn_b": rnd((1,), 0.1),
        "bn_rm": rnd((1,), 0.05),
        "bn_rv": 1.0 + jax.random.uniform(next(it), (1,), jnp.float32) * 0.1,
        "conv1_w": rnd((CH_CNN, 1, KSIZE)),
        "conv1_b": rnd((CH_CNN,)),
        "conv2_w": rnd((CH_CNN, 1, KSIZE)),
        "conv2_b": rnd((CH_CNN,)),
        "fc1_w": rnd((CH_FC, INCOMING), 0.05),
        "fc1_b": rnd((CH_FC,)),
        "fc3_w": rnd((action_space, CH_FC)),
        "fc3_b": rnd((action_space,)),
    }
    for k in range(N_SCALAR_FC):
        p[f"fc_{k}_w"] = rnd((CH_FC, 1))
        p[f"fc_{k}_b"] = rnd((CH_FC,))
    return p


if __name__ == "__main__":
    action_space = 6
    key = jax.random.PRNGKey(0)
    pkey, xkey = jax.random.split(key)
    params = init_params(pkey, action_space)

    # Fold weights once (hoisted out of the per-call hot path).
    fused = build_fused_weights(params)
    forward = jax.jit(mactor_forward)

    # inputs: [batch=2, channels=8, length=8]  (channel 2 is unused by forward).
    x = jax.random.normal(xkey, (2, N_CH, SEQ), jnp.float32)

    out = forward(fused, x)
    out = jax.block_until_ready(out)
    assert out.shape == (2, action_space)

    ref = mactor_reference(params, x)
    # bf16 MXU matmuls (f32 accumulation) in the kernel vs f32 reference.
    np.testing.assert_allclose(np.asarray(out), np.asarray(ref), rtol=5e-3, atol=5e-3)
    # Softmax rows must sum to 1 (exact divide in the kernel, f32 throughout).
    np.testing.assert_allclose(np.asarray(out).sum(axis=1), 1.0, rtol=0, atol=1e-4)

    print("KERNEL_OK")
</pallas_src>

<mosaic_0001>
module attributes {stable_mosaic.version = 11 : i64} {
  func.func @mactor_kernel(%arg0: i32, %arg1: memref<8x64xf32, #tpu.memory_space<vmem>>, %arg2: memref<64x1280xbf16, #tpu.memory_space<vmem>>, %arg3: memref<1x1280xf32, #tpu.memory_space<vmem>>, %arg4: memref<5x128xf32, #tpu.memory_space<vmem>>, %arg5: memref<5x128xf32, #tpu.memory_space<vmem>>, %arg6: memref<1280x128xbf16, #tpu.memory_space<vmem>>, %arg7: memref<640x128xbf16, #tpu.memory_space<vmem>>, %arg8: memref<1x128xf32, #tpu.memory_space<vmem>>, %arg9: memref<128x6xbf16, #tpu.memory_space<vmem>>, %arg10: memref<1x6xf32, #tpu.memory_space<vmem>>, %arg11: memref<8x6xf32, #tpu.memory_space<vmem>>) attributes {dimension_semantics = [#tpu.dimension_semantics<parallel>], iteration_bounds = array<i64: 1>, scalar_prefetch = 0 : i64, scratch_operands = 0 : i64, tpu.core_type = #tpu.core_type<tc>, window_params = [{transform_indices = @transform_0, window_bounds = array<i64: 8, 64>}, {pipeline_mode = #tpu.pipeline_mode<synchronous>, transform_indices = @transform_1, window_bounds = array<i64: 64, 1280>}, {pipeline_mode = #tpu.pipeline_mode<synchronous>, transform_indices = @transform_2, window_bounds = array<i64: 1, 1280>}, {pipeline_mode = #tpu.pipeline_mode<synchronous>, transform_indices = @transform_3, window_bounds = array<i64: 5, 128>}, {pipeline_mode = #tpu.pipeline_mode<synchronous>, transform_indices = @transform_4, window_bounds = array<i64: 5, 128>}, {pipeline_mode = #tpu.pipeline_mode<synchronous>, transform_indices = @transform_5, window_bounds = array<i64: 1280, 128>}, {pipeline_mode = #tpu.pipeline_mode<synchronous>, transform_indices = @transform_6, window_bounds = array<i64: 640, 128>}, {pipeline_mode = #tpu.pipeline_mode<synchronous>, transform_indices = @transform_7, window_bounds = array<i64: 1, 128>}, {pipeline_mode = #tpu.pipeline_mode<synchronous>, transform_indices = @transform_8, window_bounds = array<i64: 128, 6>}, {pipeline_mode = #tpu.pipeline_mode<synchronous>, transform_indices = @transform_9, window_bounds = array<i64: 1, 6>}, {transform_indices = @transform_10, window_bounds = array<i64: 8, 6>}]} {
    %c0 = arith.constant 0 : index
    %c0_0 = arith.constant 0 : index
    %0 = vector.load %arg1[%c0, %c0_0] : memref<8x64xf32, #tpu.memory_space<vmem>>, vector<8x64xf32>
    %1 = arith.truncf %0 : vector<8x64xf32> to vector<8x64xbf16>
    %c0_1 = arith.constant 0 : index
    %c0_2 = arith.constant 0 : index
    %2 = vector.load %arg2[%c0_1, %c0_2] : memref<64x1280xbf16, #tpu.memory_space<vmem>>, vector<64x1280xbf16>
    %cst = arith.constant dense<0.000000e+00> : vector<8x1280xf32>
    %3 = tpu.matmul %1, %2, %cst {dimension_numbers = #tpu.dot_dimension_numbers<[1], [0], [0], [1], [0, 0, 1, 1], [], []>} : vector<8x64xbf16>, vector<64x1280xbf16>, vector<8x1280xf32> -> vector<8x1280xf32>
    %c0_3 = arith.constant 0 : index
    %c0_4 = arith.constant 0 : index
    %4 = vector.load %arg3[%c0_3, %c0_4] : memref<1x1280xf32, #tpu.memory_space<vmem>>, vector<1x1280xf32>
    %5 = vector.broadcast %4 : vector<1x1280xf32> to vector<8x1280xf32>
    %6 = arith.addf %3, %5 : vector<8x1280xf32>
    %cst_5 = arith.constant 0.000000e+00 : f32
    %7 = vector.broadcast %cst_5 : f32 to vector<8x1280xf32>
    %8 = arith.maximumf %6, %7 : vector<8x1280xf32>
    %9 = vector.extract_strided_slice %0 {offsets = [0, 31], sizes = [8, 1], strides = [1, 1]} : vector<8x64xf32> to vector<8x1xf32>
    %c0_6 = arith.constant 0 : index
    %c0_7 = arith.constant 0 : index
    %10 = vector.load %arg4[%c0_6, %c0_7] : memref<5x128xf32, #tpu.memory_space<vmem>>, vector<1x128xf32>
    %11 = vector.broadcast %9 : vector<8x1xf32> to vector<8x128xf32>
    %12 = vector.broadcast %10 : vector<1x128xf32> to vector<8x128xf32>
    %13 = arith.mulf %11, %12 : vector<8x128xf32>
    %c0_8 = arith.constant 0 : index
    %c0_9 = arith.constant 0 : index
    %14 = vector.load %arg5[%c0_8, %c0_9] : memref<5x128xf32, #tpu.memory_space<vmem>>, vector<1x128xf32>
    %15 = vector.broadcast %14 : vector<1x128xf32> to vector<8x128xf32>
    %16 = arith.addf %13, %15 : vector<8x128xf32>
    %cst_10 = arith.constant 0.000000e+00 : f32
    %17 = vector.broadcast %cst_10 : f32 to vector<8x128xf32>
    %18 = arith.maximumf %16, %17 : vector<8x128xf32>
    %19 = vector.extract_strided_slice %0 {offsets = [0, 39], sizes = [8, 1], strides = [1, 1]} : vector<8x64xf32> to vector<8x1xf32>
    %c1 = arith.constant 1 : index
    %c0_11 = arith.constant 0 : index
    %20 = vector.load %arg4[%c1, %c0_11] : memref<5x128xf32, #tpu.memory_space<vmem>>, vector<1x128xf32>
    %21 = vector.broadcast %19 : vector<8x1xf32> to vector<8x128xf32>
    %22 = vector.broadcast %20 : vector<1x128xf32> to vector<8x128xf32>
    %23 = arith.mulf %21, %22 : vector<8x128xf32>
    %c1_12 = arith.constant 1 : index
    %c0_13 = arith.constant 0 : index
    %24 = vector.load %arg5[%c1_12, %c0_13] : memref<5x128xf32, #tpu.memory_space<vmem>>, vector<1x128xf32>
    %25 = vector.broadcast %24 : vector<1x128xf32> to vector<8x128xf32>
    %26 = arith.addf %23, %25 : vector<8x128xf32>
    %cst_14 = arith.constant 0.000000e+00 : f32
    %27 = vector.broadcast %cst_14 : f32 to vector<8x128xf32>
    %28 = arith.maximumf %26, %27 : vector<8x128xf32>
    %29 = vector.extract_strided_slice %0 {offsets = [0, 47], sizes = [8, 1], strides = [1, 1]} : vector<8x64xf32> to vector<8x1xf32>
    %c2 = arith.constant 2 : index
    %c0_15 = arith.constant 0 : index
    %30 = vector.load %arg4[%c2, %c0_15] : memref<5x128xf32, #tpu.memory_space<vmem>>, vector<1x128xf32>
    %31 = vector.broadcast %29 : vector<8x1xf32> to vector<8x128xf32>
    %32 = vector.broadcast %30 : vector<1x128xf32> to vector<8x128xf32>
    %33 = arith.mulf %31, %32 : vector<8x128xf32>
    %c2_16 = arith.constant 2 : index
    %c0_17 = arith.constant 0 : index
    %34 = vector.load %arg5[%c2_16, %c0_17] : memref<5x128xf32, #tpu.memory_space<vmem>>, vector<1x128xf32>
    %35 = vector.broadcast %34 : vector<1x128xf32> to vector<8x128xf32>
    %36 = arith.addf %33, %35 : vector<8x128xf32>
    %cst_18 = arith.constant 0.000000e+00 : f32
    %37 = vector.broadcast %cst_18 : f32 to vector<8x128xf32>
    %38 = arith.maximumf %36, %37 : vector<8x128xf32>
    %39 = vector.extract_strided_slice %0 {offsets = [0, 55], sizes = [8, 1], strides = [1, 1]} : vector<8x64xf32> to vector<8x1xf32>
    %c3 = arith.constant 3 : index
    %c0_19 = arith.constant 0 : index
    %40 = vector.load %arg4[%c3, %c0_19] : memref<5x128xf32, #tpu.memory_space<vmem>>, vector<1x128xf32>
    %41 = vector.broadcast %39 : vector<8x1xf32> to vector<8x128xf32>
    %42 = vector.broadcast %40 : vector<1x128xf32> to vector<8x128xf32>
    %43 = arith.mulf %41, %42 : vector<8x128xf32>
    %c3_20 = arith.constant 3 : index
    %c0_21 = arith.constant 0 : index
    %44 = vector.load %arg5[%c3_20, %c0_21] : memref<5x128xf32, #tpu.memory_space<vmem>>, vector<1x128xf32>
    %45 = vector.broadcast %44 : vector<1x128xf32> to vector<8x128xf32>
    %46 = arith.addf %43, %45 : vector<8x128xf32>
    %cst_22 = arith.constant 0.000000e+00 : f32
    %47 = vector.broadcast %cst_22 : f32 to vector<8x128xf32>
    %48 = arith.maximumf %46, %47 : vector<8x128xf32>
    %49 = vector.extract_strided_slice %0 {offsets = [0, 63], sizes = [8, 1], strides = [1, 1]} : vector<8x64xf32> to vector<8x1xf32>
    %c4 = arith.constant 4 : index
    %c0_23 = arith.constant 0 : index
    %50 = vector.load %arg4[%c4, %c0_23] : memref<5x128xf32, #tpu.memory_space<vmem>>, vector<1x128xf32>
    %51 = vector.broadcast %49 : vector<8x1xf32> to vector<8x128xf32>
    %52 = vector.broadcast %50 : vector<1x128xf32> to vector<8x128xf32>
    %53 = arith.mulf %51, %52 : vector<8x128xf32>
    %c4_24 = arith.constant 4 : index
    %c0_25 = arith.constant 0 : index
    %54 = vector.load %arg5[%c4_24, %c0_25] : memref<5x128xf32, #tpu.memory_space<vmem>>, vector<1x128xf32>
    %55 = vector.broadcast %54 : vector<1x128xf32> to vector<8x128xf32>
    %56 = arith.addf %53, %55 : vector<8x128xf32>
    %cst_26 = arith.constant 0.000000e+00 : f32
    %57 = vector.broadcast %cst_26 : f32 to vector<8x128xf32>
    %58 = arith.maximumf %56, %57 : vector<8x128xf32>
    %59 = tpu.concatenate %18, %28, %38, %48, %58 in 1 : vector<8x128xf32>, vector<8x128xf32>, vector<8x128xf32>, vector<8x128xf32>, vector<8x128xf32> -> vector<8x640xf32>
    %60 = arith.truncf %59 : vector<8x640xf32> to vector<8x640xbf16>
    %61 = arith.truncf %8 : vector<8x1280xf32> to vector<8x1280xbf16>
    %c0_27 = arith.constant 0 : index
    %c0_28 = arith.constant 0 : index
    %62 = vector.load %arg6[%c0_27, %c0_28] : memref<1280x128xbf16, #tpu.memory_space<vmem>>, vector<1280x128xbf16>
    %cst_29 = arith.constant dense<0.000000e+00> : vector<8x128xf32>
    %63 = tpu.matmul %61, %62, %cst_29 {dimension_numbers = #tpu.dot_dimension_numbers<[1], [0], [0], [1], [0, 0, 1, 1], [], []>} : vector<8x1280xbf16>, vector<1280x128xbf16>, vector<8x128xf32> -> vector<8x128xf32>
    %c0_30 = arith.constant 0 : index
    %c0_31 = arith.constant 0 : index
    %64 = vector.load %arg7[%c0_30, %c0_31] : memref<640x128xbf16, #tpu.memory_space<vmem>>, vector<640x128xbf16>
    %cst_32 = arith.constant dense<0.000000e+00> : vector<8x128xf32>
    %65 = tpu.matmul %60, %64, %cst_32 {dimension_numbers = #tpu.dot_dimension_numbers<[1], [0], [0], [1], [0, 0, 1, 1], [], []>} : vector<8x640xbf16>, vector<640x128xbf16>, vector<8x128xf32> -> vector<8x128xf32>
    %66 = arith.addf %63, %65 : vector<8x128xf32>
    %c0_33 = arith.constant 0 : index
    %c0_34 = arith.constant 0 : index
    %67 = vector.load %arg8[%c0_33, %c0_34] : memref<1x128xf32, #tpu.memory_space<vmem>>, vector<1x128xf32>
    %68 = vector.broadcast %67 : vector<1x128xf32> to vector<8x128xf32>
    %69 = arith.addf %66, %68 : vector<8x128xf32>
    %cst_35 = arith.constant 0.000000e+00 : f32
    %70 = vector.broadcast %cst_35 : f32 to vector<8x128xf32>
    %71 = arith.maximumf %69, %70 : vector<8x128xf32>
    %72 = arith.truncf %71 : vector<8x128xf32> to vector<8x128xbf16>
    %c0_36 = arith.constant 0 : index
    %c0_37 = arith.constant 0 : index
    %73 = vector.load %arg9[%c0_36, %c0_37] : memref<128x6xbf16, #tpu.memory_space<vmem>>, vector<128x6xbf16>
    %cst_38 = arith.constant dense<0.000000e+00> : vector<8x6xf32>
    %74 = tpu.matmul %72, %73, %cst_38 {dimension_numbers = #tpu.dot_dimension_numbers<[1], [0], [0], [1], [0, 0, 1, 1], [], []>} : vector<8x128xbf16>, vector<128x6xbf16>, vector<8x6xf32> -> vector<8x6xf32>
    %c0_39 = arith.constant 0 : index
    %c0_40 = arith.constant 0 : index
    %75 = vector.load %arg10[%c0_39, %c0_40] : memref<1x6xf32, #tpu.memory_space<vmem>>, vector<1x6xf32>
    %76 = vector.broadcast %75 : vector<1x6xf32> to vector<8x6xf32>
    %77 = arith.addf %74, %76 : vector<8x6xf32>
    %cst_41 = arith.constant dense<0xFF800000> : vector<8xf32>
    %78 = vector.multi_reduction <maximumf>, %77, %cst_41 [1] : vector<8x6xf32> to vector<8xf32>
    %79 = vector.shape_cast %78 : vector<8xf32> to vector<8x1xf32>
    %80 = vector.broadcast %79 : vector<8x1xf32> to vector<8x6xf32>
    %81 = arith.subf %77, %80 : vector<8x6xf32>
    %82 = math.exp %81 : vector<8x6xf32>
    %cst_42 = arith.constant dense<0.000000e+00> : vector<8xf32>
    %83 = vector.multi_reduction <add>, %82, %cst_42 [1] : vector<8x6xf32> to vector<8xf32>
    %84 = vector.shape_cast %83 : vector<8xf32> to vector<8x1xf32>
    %85 = vector.broadcast %84 : vector<8x1xf32> to vector<8x6xf32>
    %86 = arith.divf %82, %85 : vector<8x6xf32>
    %c0_43 = arith.constant 0 : index
    %c0_44 = arith.constant 0 : index
    %87 = vector.load %arg11[%c0_43, %c0_44] : memref<8x6xf32, #tpu.memory_space<vmem>>, vector<8x6xf32>
    tpu.vector_store %arg11[%c0_43, %c0_44], %86 {strides = array<i32>} : memref<8x6xf32, #tpu.memory_space<vmem>>, vector<8x6xf32>,
    return
  }
  func.func @transform_0(%arg0: i32) -> (i32, i32) {
    %c0_i32 = arith.constant 0 : i32
    %c0_i32_0 = arith.constant 0 : i32
    return %arg0, %c0_i32 : i32, i32
  }
  func.func @transform_1(%arg0: i32) -> (i32, i32) {
    %c0_i32 = arith.constant 0 : i32
    %c0_i32_0 = arith.constant 0 : i32
    %c0_i32_1 = arith.constant 0 : i32
    return %c0_i32, %c0_i32_0 : i32, i32
  }
  func.func @transform_2(%arg0: i32) -> (i32, i32) {
    %c0_i32 = arith.constant 0 : i32
    %c0_i32_0 = arith.constant 0 : i32
    %c0_i32_1 = arith.constant 0 : i32
    return %c0_i32, %c0_i32_0 : i32, i32
  }
  func.func @transform_3(%arg0: i32) -> (i32, i32) {
    %c0_i32 = arith.constant 0 : i32
    %c0_i32_0 = arith.constant 0 : i32
    %c0_i32_1 = arith.constant 0 : i32
    return %c0_i32, %c0_i32_0 : i32, i32
  }
  func.func @transform_4(%arg0: i32) -> (i32, i32) {
    %c0_i32 = arith.constant 0 : i32
    %c0_i32_0 = arith.constant 0 : i32
    %c0_i32_1 = arith.constant 0 : i32
    return %c0_i32, %c0_i32_0 : i32, i32
  }
  func.func @transform_5(%arg0: i32) -> (i32, i32) {
    %c0_i32 = arith.constant 0 : i32
    %c0_i32_0 = arith.constant 0 : i32
    %c0_i32_1 = arith.constant 0 : i32
    return %c0_i32, %c0_i32_0 : i32, i32
  }
  func.func @transform_6(%arg0: i32) -> (i32, i32) {
    %c0_i32 = arith.constant 0 : i32
    %c0_i32_0 = arith.constant 0 : i32
    %c0_i32_1 = arith.constant 0 : i32
    return %c0_i32, %c0_i32_0 : i32, i32
  }
  func.func @transform_7(%arg0: i32) -> (i32, i32) {
    %c0_i32 = arith.constant 0 : i32
    %c0_i32_0 = arith.constant 0 : i32
    %c0_i32_1 = arith.constant 0 : i32
    return %c0_i32, %c0_i32_0 : i32, i32
  }
  func.func @transform_8(%arg0: i32) -> (i32, i32) {
    %c0_i32 = arith.constant 0 : i32
    %c0_i32_0 = arith.constant 0 : i32
    %c0_i32_1 = arith.constant 0 : i32
    return %c0_i32, %c0_i32_0 : i32, i32
  }
  func.func @transform_9(%arg0: i32) -> (i32, i32) {
    %c0_i32 = arith.constant 0 : i32
    %c0_i32_0 = arith.constant 0 : i32
    %c0_i32_1 = arith.constant 0 : i32
    return %c0_i32, %c0_i32_0 : i32, i32
  }
  func.func @transform_10(%arg0: i32) -> (i32, i32) {
    %c0_i32 = arith.constant 0 : i32
    %c0_i32_0 = arith.constant 0 : i32
    return %arg0, %c0_i32 : i32, i32
  }
}

</mosaic_0001>

<bundles_post_ra>
// kernel: mactor_forward.1
= control target key start
LH: loop header
LB: loop body
LE: loop exit
PB: predicated region body
PF: predicated region fallthrough
CT: control target
= control target key end

     0   :  { %15 = vsyncpa [#allocation3], 0  ;;  %s3045_s0 = inlined_call_operand.vmem [shape: f32[8,64], index: 0, kind: input, shape index: {}]   ;;  %s3046_s1 = inlined_call_operand.hbm [shape: bf16[64,1280], index: 1, kind: input, shape index: {}]   ;;  %s3047_s2 = inlined_call_operand.vmem [shape: f32[1,1280], index: 2, kind: input, shape index: {}]   ;;  %s3048_s3 = inlined_call_operand.vmem [shape: f32[5,128], index: 3, kind: input, shape index: {}]   ;;  %s3049_s4 = inlined_call_operand.vmem [shape: f32[5,128], index: 4, kind: input, shape index: {}]   ;;  %s3050_s5 = inlined_call_operand.hbm [shape: bf16[1280,128], index: 5, kind: input, shape index: {}]   ;;  %s3051_s6 = inlined_call_operand.hbm [shape: bf16[640,128], index: 6, kind: input, shape index: {}]   ;;  %s3052_s7 = inlined_call_operand.vmem [shape: f32[1,128], index: 7, kind: input, shape index: {}]   ;;  %s3053_s8 = inlined_call_operand.vmem [shape: bf16[128,6], index: 8, kind: input, shape index: {}]   ;;  %s3054_s9 = inlined_call_operand.vmem [shape: f32[1,6], index: 9, kind: input, shape index: {}]   ;;  %s3055_s10 = inlined_call_operand.vmem [shape: f32[8,6], index: 10, kind: output, shape index: {}]  }
   0x1   :  { %16 = vsyncpa [#allocation5], 0  ;;  %s2793_s13 = smov [#allocation4]   ;;  %s2723_s17 = scalar_lea.hbm %s3050_s5, 10240 }
   0x2   :  { %s42_s14 = sshll.u32 %s2793_s13, 4  ;;  %p2724_p0 = scmp.ne.s32.totalorder %s3050_s5, %s2723_s17  ;;  %s43_s14 = int_to_ptr.vmem [resolvable:$true] %s42_s14 }
   0x3   :  { %p2727_p1 = scmp.lt.u32.totalorder %s2723_s17, %s3050_s5 }
   0x5   :  { %p2729_p2 = pnand %p2727_p1, %p2724_p0 }
   0x7   :  { %2732 = shalt.err (!%p2729_p2)
}
   0x8   :  { %s2733_s22 = scalar_lea.vmem %s43_s14, 10240  ;;  %p2738_p4 = scmp.lt.s32.totalorder %s43_s14, %s43_s14 }
   0x9   :  { %p2734_p3 = scmp.ne.s32.totalorder %s43_s14, %s2733_s22  ;;  %p2739_p5 = scmp.lt.s32.totalorder %s2733_s22, %s2733_s22 }
   0xb   :  { %p2740_p6 = por %p2739_p5, %p2738_p4 }
   0xd   :  { %p2741_p7 = pnand %p2740_p6, %p2734_p3 }
   0xf   :  { %2744 = shalt.err (!%p2741_p7)
}
  0x10   :  { %s2794_s23 = smov 64   ;;  %s2795_s24 = smov 4  }
  0x11   :  { %48 = dma.hbm_to_vmem [thread:$0]  %s3050_s5, 10240, %s43_s14, [#allocation5], %s2794_s23, %s2794_s23, %s2795_s24  }
  0x12   :  { %s2796_s27 = smov [#allocation2]   ;;  %s2745_s11 = scalar_lea.hbm %s3046_s1, 5120 }
  0x13   :  { %s24_s28 = sshll.u32 %s2796_s27, 4  ;;  %p2746_p8 = scmp.ne.s32.totalorder %s3046_s1, %s2745_s11  ;;  %s25_s28 = int_to_ptr.vmem [resolvable:$true] %s24_s28 }
  0x14   :  { %p2749_p9 = scmp.lt.u32.totalorder %s2745_s11, %s3046_s1 }
  0x16   :  { %p2751_p10 = pnand %p2749_p9, %p2746_p8 }
  0x18   :  { %2754 = shalt.err (!%p2751_p10)
}
  0x19   :  { %s2755_s17 = scalar_lea.vmem %s25_s28, 5120  ;;  %p2760_p12 = scmp.lt.s32.totalorder %s25_s28, %s25_s28 }
  0x1a   :  { %p2756_p11 = scmp.ne.s32.totalorder %s25_s28, %s2755_s17  ;;  %p2761_p13 = scmp.lt.s32.totalorder %s2755_s17, %s2755_s17 }
  0x1c   :  { %p2762_p0 = por %p2761_p13, %p2760_p12 }
  0x1e   :  { %p2763_p1 = pnand %p2762_p0, %p2756_p11 }
  0x20   :  { %2766 = shalt.err (!%p2763_p1)
}
  0x21   :  { %s2797_s5 = smov 640   ;;  %s2798_s14 = smov 40  }
  0x22   :  { %30 = dma.hbm_to_vmem [thread:$0]  %s3046_s1, 5120, %s25_s28, [#allocation3], %s2797_s5, %s2797_s5, %s2798_s14  }
  0x23   :  { %s2799_s20 = smov [#allocation6]   ;;  %s2767_s26 = scalar_lea.hbm %s3051_s6, 5120 }
  0x24   :  { %s54_s21 = sshll.u32 %s2799_s20, 4  ;;  %p2768_p2 = scmp.ne.s32.totalorder %s3051_s6, %s2767_s26  ;;  %s55_s21 = int_to_ptr.vmem [resolvable:$true] %s54_s21 }
  0x25   :  { %p2771_p3 = scmp.lt.u32.totalorder %s2767_s26, %s3051_s6 }
  0x27   :  { %p2773_p4 = pnand %p2771_p3, %p2768_p2 }
  0x29   :  { %2776 = shalt.err (!%p2773_p4)
}
  0x2a   :  { %s2777_s12 = scalar_lea.vmem %s55_s21, 5120  ;;  %p2782_p6 = scmp.lt.s32.totalorder %s55_s21, %s55_s21 }
  0x2b   :  { %p2778_p5 = scmp.ne.s32.totalorder %s55_s21, %s2777_s12  ;;  %p2783_p7 = scmp.lt.s32.totalorder %s2777_s12, %s2777_s12 }
  0x2d   :  { %p2784_p8 = por %p2783_p7, %p2782_p6 }
  0x2f   :  { %p2785_p9 = pnand %p2784_p8, %p2778_p5 }
  0x31   :  { %2788 = shalt.err (!%p2785_p9)
}
  0x32   :  { %60 = dma.hbm_to_vmem [thread:$0]  %s3051_s6, 5120, %s55_s21, [#allocation5], %s2794_s23, %s2794_s23, %s2795_s24  }
  0x33   :  { %2789 = dma.done.wait [#allocation3], 5120  }
  0x34   :  { %2790 = vsyncadd [#allocation3], 4294962176 }
  0x35   :  { %2791 = dma.done.wait [#allocation5], 15360  }
  0x36   :  { %2792 = vsyncadd [#allocation5], 4294951936  ;;  %v2800_v0 = vmov 0   ;;  %v2801_v1 = vmov 39   ;;  %v2802_v2 = vmov 55   ;;  %v77_v17 = vld [vmem:[%s3045_s0] sm:$0xff] }
  0x37   :  { %409 = vmatprep.mubr.bf16.mxu0 %v2800_v0  ;;  %450 = vmatprep.mubr.bf16.mxu1 %v2800_v0  ;;  %v2531_v3 = vld [vmem:[#allocation2 + $0x4] ss:$40 sps:$4 sm:$0xff]   ;;  %v2533_v4 = vld [vmem:[#allocation2] ss:$40 sps:$4 sm:$0xff]   ;;  %v2537_v7 = vld [vmem:[#allocation2 + $0x54] ss:$40 sps:$4 sm:$0xff]   ;;  %v2910_v21 = vpack.c.bf16 %v77_v17, %v77_v17 }
  0x38   :  { %2525 = vset.pattern.permute.xlu0 %v2801_v1  ;;  %2527 = vset.pattern.permute.xlu1 %v2802_v2  ;;  %v2534_v5 = vld [vmem:[#allocation2 + $0xc] ss:$40 sps:$4 sm:$0xff]   ;;  %v2536_v6 = vld [vmem:[#allocation2 + $0x8] ss:$40 sps:$4 sm:$0xff]   ;;  %v2540_v9 = vld [vmem:[#allocation2 + $0x5c] ss:$40 sps:$4 sm:$0xff]  }
  0x39   :  { %377 = vmatprep.subr.bf16.mxu0 %v2531_v3  ;;  %v2539_v8 = vld [vmem:[#allocation2 + $0x50] ss:$40 sps:$4 sm:$0xff]   ;;  %418 = vmatprep.subr.bf16.mxu1 %v2534_v5  ;;  %v2543_v11 = vld [vmem:[#allocation2 + $0xa4] ss:$40 sps:$4 sm:$0xff]   ;;  %v2545_v12 = vld [vmem:[#allocation2 + $0xa0] ss:$40 sps:$4 sm:$0xff]  }
  0x3a   :  { %378 = vmatpush1.bf16.msra.mxu0 %v2533_v4  ;;  %419 = vmatpush1.bf16.msra.mxu1 %v2536_v6  ;;  %v2542_v10 = vld [vmem:[#allocation2 + $0x58] ss:$40 sps:$4 sm:$0xff]   ;;  %v2546_v13 = vld [vmem:[#allocation2 + $0xac] ss:$40 sps:$4 sm:$0xff]   ;;  %v2548_v15 = vld [vmem:[#allocation2 + $0xa8] ss:$40 sps:$4 sm:$0xff]  }
  0x3b   :  { %379 = vmatprep.subr.bf16.mxu0 %v2537_v7  ;;  %420 = vmatprep.subr.bf16.mxu1 %v2540_v9  ;;  %v2549_v14 = vld [vmem:[#allocation2 + $0xf4] ss:$40 sps:$4 sm:$0xff]   ;;  %v2551_v18 = vld [vmem:[#allocation2 + $0xf0] ss:$40 sps:$4 sm:$0xff]   ;;  %vm373_vm0 = vcmask 523264   ;;  %v2803_v24 = vmov 31  }
  0x3c   :  { %v2552_v16 = vld [vmem:[#allocation2 + $0xfc] ss:$40 sps:$4 sm:$0xff]   ;;  %612 = vperm.xlu0 %2525, %v77_v17   ;;  %646 = vperm.xlu1 %2527, %v77_v17   ;;  %v2554_v20 = vld [vmem:[#allocation2 + $0xf8] ss:$40 sps:$4 sm:$0xff]   ;;  %v2804_v27 = vmov 47   ;;  %v2805_v34 = vmov 63  }
  0x3d   :  { %v2557_v19 = vld [vmem:[#allocation2 + $0x14] ss:$40 sps:$4 sm:$0xff]   ;;  %v2555_v23 = vld [vmem:[#allocation2 + $0x10] ss:$40 sps:$4 sm:$0xff]   ;;  %v2563_v25 = vld [vmem:[#allocation2 + $0x64] ss:$40 sps:$4 sm:$0xff]  }
  0x3e   :  { %380 = vmatpush1.bf16.msra.mxu0 %v2539_v8  ;;  %421 = vmatpush1.bf16.msra.mxu1 %v2542_v10  ;;  %v2560_v22 = vld [vmem:[#allocation2 + $0x1c] ss:$40 sps:$4 sm:$0xff]   ;;  %v2558_v26 = vld [vmem:[#allocation2 + $0x18] ss:$40 sps:$4 sm:$0xff]   ;;  %v2569_v28 = vld [vmem:[#allocation2 + $0x6c] ss:$40 sps:$4 sm:$0xff]  }
  0x3f   :  { %381 = vmatprep.subr.bf16.mxu0 %v2543_v11  ;;  %422 = vmatprep.subr.bf16.mxu1 %v2546_v13  ;;  %v2561_v29 = vld [vmem:[#allocation2 + $0x60] ss:$40 sps:$4 sm:$0xff]   ;;  %v2566_v30 = vld [vmem:[#allocation2 + $0xb4] ss:$40 sps:$4 sm:$0xff]   ;;  %v2564_v33 = vld [vmem:[#allocation2 + $0xb0] ss:$40 sps:$4 sm:$0xff]  }
  0x40   :  { %2526 = vset.pattern.permute.xlu0 %v2803_v24  ;;  %2528 = vset.pattern.permute.xlu1 %v2804_v27  ;;  %v2567_v31 = vld [vmem:[#allocation2 + $0x68] ss:$40 sps:$4 sm:$0xff]   ;;  %v2575_v32 = vld [vmem:[#allocation2 + $0xbc] ss:$40 sps:$4 sm:$0xff]   ;;  %v2573_v36 = vld [vmem:[#allocation2 + $0xb8] ss:$40 sps:$4 sm:$0xff]  }
  0x41   :  { %595 = vperm.xlu0 %2526, %v77_v17   ;;  %629 = vperm.xlu1 %2528, %v77_v17   ;;  %v2572_v35 = vld [vmem:[#allocation2 + $0x104] ss:$40 sps:$4 sm:$0xff]   ;;  %v2570_v38 = vld [vmem:[#allocation2 + $0x100] ss:$40 sps:$4 sm:$0xff]   ;;  %v2584_v43 = vld [vmem:[#allocation2 + $0x74] ss:$40 sps:$4 sm:$0xff]  }
  0x42   :  { %382 = vmatpush1.bf16.msra.mxu0 %v2545_v12  ;;  %423 = vmatpush1.bf16.msra.mxu1 %v2548_v15  ;;  %v2578_v37 = vld [vmem:[#allocation2 + $0x10c] ss:$40 sps:$4 sm:$0xff]   ;;  %v2576_v40 = vld [vmem:[#allocation2 + $0x108] ss:$40 sps:$4 sm:$0xff]   ;;  %v2591_v41 = vld [vmem:[#allocation6 + $0x40] sm:$0xff]   ;;  %v2806_v11 = vmov 0.0  }
  0x43   :  { %383 = vmatprep.subr.bf16.mxu0 %v2549_v14  ;;  %424 = vmatprep.subr.bf16.mxu1 %v2552_v16  ;;  %v2581_v39 = vld [vmem:[#allocation2 + $0x24] ss:$40 sps:$4 sm:$0xff]   ;;  %v2579_v42 = vld [vmem:[#allocation2 + $0x20] ss:$40 sps:$4 sm:$0xff]   ;;  %v2582_v46 = vld [vmem:[#allocation2 + $0x70] ss:$40 sps:$4 sm:$0xff]  }
  0x44   :  { %v2592_v44 = vld [vmem:[#allocation6] sm:$0xff]   ;;  %v2593_v45 = vld [vmem:[#allocation6 + $0x48] sm:$0xff]   ;;  %v2595_v49 = vld [vmem:[#allocation6 + $0x50] sm:$0xff]   ;;  %vm2807_vm1 = vmmov 0   ;;  %vm2094_vm2 = vcmask 48128  }
  0x45   :  { %2530 = vset.pattern.permute.xlu0 %v2805_v34  ;;  %2529 = vset.pattern.permute.xlu1 %v2805_v34  ;;  %v2587_v47 = vld [vmem:[#allocation2 + $0xc4] ss:$40 sps:$4 sm:$0xff]   ;;  %v2585_v50 = vld [vmem:[#allocation2 + $0xc0] ss:$40 sps:$4 sm:$0xff]   ;;  %v2590_v51 = vld [vmem:[#allocation2 + $0x114] ss:$40 sps:$4 sm:$0xff]  }
  0x46   :  { %384 = vmatpush1.bf16.msra.mxu0 %v2551_v18  ;;  %425 = vmatpush1.bf16.msra.mxu1 %v2554_v20  ;;  %v2594_v48 = vld [vmem:[#allocation6 + $0x8] sm:$0xff]   ;;  %v2596_v52 = vld [vmem:[#allocation6 + $0x10] sm:$0xff]   ;;  %v2597_v53 = vld [vmem:[#allocation6 + $0x58] sm:$0xff]  }
  0x47   :  { %459 = vmatprep.subr.bf16.mxu0 %v2557_v19  ;;  %500 = vmatprep.subr.bf16.mxu1 %v2560_v22  ;;  %v2588_v54 = vld [vmem:[#allocation2 + $0x110] ss:$40 sps:$4 sm:$0xff]   ;;  %v2606_v55 = vld [vmem:[#allocation6 + $0xc0] sm:$0xff]   ;;  %v2609_v59 = vld [vmem:[#allocation6 + $0xc8] sm:$0xff]  }
  0x48   :  { %663 = vperm.xlu1 %2529, %v77_v17   ;;  %v2598_v56 = vld [vmem:[#allocation6 + $0x18] sm:$0xff]   ;;  %v2599_v57 = vld [vmem:[#allocation6 + $0x60] sm:$0xff]   ;;  %v2601_v61 = vld [vmem:[#allocation6 + $0x68] sm:$0xff]  }
  0x49   :  { %2153 = vmatmul.mubr.msk.bf16.vlgmr.msra.gmra.mrb[0].mxu0 %vm373_vm0, %v2910_v21  ;;  %2154 = vmatmul.mubr.msk.bf16.vlgmr.msra.gmra.mrb[0].mxu1 %vm373_vm0, %v2910_v21  ;;  %v2608_v58 = vld [vmem:[#allocation6 + $0x80] sm:$0xff]   ;;  %v2610_v62 = vld [vmem:[#allocation6 + $0x88] sm:$0xff]   ;;  %v2612_v63 = vld [vmem:[#allocation6 + $0xd0] sm:$0xff]  }
  0x4a   :  { %460 = vmatpush1.bf16.msra.mxu0 %v2555_v23  ;;  %491 = vmatprep.mubr.bf16.mxu0 %v2800_v0  ;;  %v2600_v60 = vld [vmem:[#allocation6 + $0x20] sm:$0xff]   ;;  %v2603_v1 = vld [vmem:[#allocation6 + $0x70] sm:$0xff]   ;;  %v2615_v3 = vld [vmem:[#allocation6 + $0xd8] sm:$0xff]  }
  0x4b   :  { %461 = vmatprep.subr.bf16.mxu0 %v2563_v25  ;;  %501 = vmatpush1.bf16.msra.mxu1 %v2558_v26  ;;  %v2613_v2 = vld [vmem:[#allocation6 + $0x90] sm:$0xff]   ;;  %v2605_v5 = vld [vmem:[#allocation6 + $0x78] sm:$0xff]   ;;  %v2618_v7 = vld [vmem:[#allocation6 + $0xe0] sm:$0xff]  }
  0x4c   :  { %532 = vmatprep.mubr.bf16.mxu1 %v2800_v0  ;;  %502 = vmatprep.subr.bf16.mxu1 %v2569_v28  ;;  %v2604_v4 = vld [vmem:[#allocation6 + $0x30] sm:$0xff]   ;;  %v2616_v6 = vld [vmem:[#allocation6 + $0x98] sm:$0xff]   ;;  %v2619_v9 = vld [vmem:[#allocation6 + $0xa0] sm:$0xff]  }
  0x4d   :  { %v2607_v8 = vld [vmem:[#allocation6 + $0x38] sm:$0xff]   ;;  %v2621_v10 = vld [vmem:[#allocation6 + $0xe8] sm:$0xff]   ;;  %v2624_v13 = vld [vmem:[#allocation6 + $0xf0] sm:$0xff]  }
  0x4e   :  { %462 = vmatpush1.bf16.msra.mxu0 %v2561_v29  ;;  %v2622_v12 = vld [vmem:[#allocation6 + $0xa8] sm:$0xff]   ;;  %v2625_v14 = vld [vmem:[#allocation6 + $0xb0] sm:$0xff]   ;;  %v2627_v15 = vld [vmem:[#allocation6 + $0xf8] sm:$0xff]  }
  0x4f   :  { %463 = vmatprep.subr.bf16.mxu0 %v2566_v30  ;;  %503 = vmatpush1.bf16.msra.mxu1 %v2567_v31  ;;  %v2628_v16 = vld [vmem:[#allocation6 + $0xb8] sm:$0xff]   ;;  %v2631_v17 = vld [vmem:[#allocation4 + $0x40] sm:$0xff]  }
  0x50   :  { %504 = vmatprep.subr.bf16.mxu1 %v2575_v32  ;;  %v2160_v18 = vld [vmem:[%s3048_s3 + $0x1] ss:$0 sm:$0xff]  ;;  %v2164_v19 = vld [vmem:[%s3048_s3 + $0x3] ss:$0 sm:$0xff]  ;;  %v2158_v25 = vld [vmem:[%s3048_s3] ss:$0 sm:$0xff] }
  0x51   :  { %v2161_v20 = vld [vmem:[%s3049_s4 + $0x1] ss:$0 sm:$0xff]  ;;  %v2165_v23 = vld [vmem:[%s3049_s4 + $0x3] ss:$0 sm:$0xff]  ;;  %v2159_v28 = vld [vmem:[%s3049_s4] ss:$0 sm:$0xff] }
  0x52   :  { %464 = vmatpush1.bf16.msra.mxu0 %v2564_v33 }
  0x53   :  { %465 = vmatprep.subr.bf16.mxu0 %v2572_v35  ;;  %505 = vmatpush1.bf16.msra.mxu1 %v2573_v36  ;;  %v2162_v35 = vld [vmem:[%s3048_s3 + $0x2] ss:$0 sm:$0xff] }
  0x54   :  { %506 = vmatprep.subr.bf16.mxu1 %v2578_v37 }
  0x56   :  { %466 = vmatpush1.bf16.msra.mxu0 %v2570_v38  ;;  %v2611_v38 = vld [vmem:[#allocation6 + $0x100] sm:$0xff]  }
  0x57   :  { %541 = vmatprep.subr.bf16.mxu0 %v2581_v39  ;;  %507 = vmatpush1.bf16.msra.mxu1 %v2576_v40  ;;  %v2163_v39 = vld [vmem:[%s3049_s4 + $0x2] ss:$0 sm:$0xff] }
  0x58   :  { %2298 = vmatprep.subr.bf16.mxu1 %v2591_v41 }
  0x59   :  { %2155 = vmatmul.mubr.msk.bf16.vlgmr.msra.gmra.mrb[4].mxu0 %vm373_vm0, %v2910_v21 }
  0x5a   :  { %542 = vmatpush1.bf16.msra.mxu0 %v2579_v42  ;;  %573 = vmatprep.mubr.bf16.mxu0 %v2800_v0  ;;  %v2602_v0 = vld [vmem:[#allocation6 + $0x28] sm:$0xff]  }
  0x5b   :  { %2156 = vmatmul.mubr.msk.bf16.vlgmr.msra.gmra.mrb[4].mxu1 %vm373_vm0, %v2910_v21  ;;  %543 = vmatprep.subr.bf16.mxu0 %v2584_v43 }
  0x5c   :  { %2299 = vmatpush3.bf16.msra.mxu1 %v2592_v44  ;;  %v2614_v44 = vld [vmem:[#allocation6 + $0x108] sm:$0xff]  }
  0x5d   :  { %2300 = vmatprep.subr.bf16.mxu1 %v2593_v45 }
  0x5e   :  { %544 = vmatpush1.bf16.msra.mxu0 %v2582_v46 }
  0x5f   :  { %545 = vmatprep.subr.bf16.mxu0 %v2587_v47  ;;  %v2632_v47 = vld [vmem:[#allocation4] sm:$0xff]  }
  0x60   :  { %2301 = vmatpush3.bf16.msra.mxu1 %v2594_v48 }
  0x61   :  { %2302 = vmatprep.subr.bf16.mxu1 %v2595_v49  ;;  %v2635_v49 = vld [vmem:[#allocation4 + $0x48] sm:$0xff]  }
  0x62   :  { %546 = vmatpush1.bf16.msra.mxu0 %v2585_v50  ;;  %v2617_v50 = vld [vmem:[#allocation6 + $0x110] sm:$0xff]  }
  0x63   :  { %547 = vmatprep.subr.bf16.mxu0 %v2590_v51  ;;  %v2636_v51 = vld [vmem:[#allocation4 + $0x8] sm:$0xff]  }
  0x64   :  { %2303 = vmatpush3.bf16.msra.mxu1 %v2596_v52  ;;  %v2639_v52 = vld [vmem:[#allocation4 + $0x50] sm:$0xff]  }
  0x65   :  { %2304 = vmatprep.subr.bf16.mxu1 %v2597_v53  ;;  %v2620_v53 = vld [vmem:[#allocation6 + $0x118] sm:$0xff]  }
  0x66   :  { %548 = vmatpush1.bf16.msra.mxu0 %v2588_v54  ;;  %v2640_v54 = vld [vmem:[#allocation4 + $0x10] sm:$0xff]  }
  0x67   :  { %2320 = vmatprep.subr.bf16.mxu0 %v2606_v55  ;;  %v2643_v55 = vld [vmem:[#allocation4 + $0x58] sm:$0xff]  }
  0x68   :  { %2305 = vmatpush3.bf16.msra.mxu1 %v2598_v56  ;;  %v2623_v56 = vld [vmem:[#allocation6 + $0x120] sm:$0xff]  }
  0x69   :  { %2157 = vmatmul.mubr.msk.bf16.vlgmr.msra.gmra.mrb[8].mxu0 %vm373_vm0, %v2910_v21  ;;  %2306 = vmatprep.subr.bf16.mxu1 %v2599_v57  ;;  %v2166_v57 = vld [vmem:[%s3048_s3 + $0x4] ss:$0 sm:$0xff] }
  0x6a   :  { %2321 = vmatpush3.bf16.msra.mxu0 %v2608_v58 }
  0x6b   :  { %2322 = vmatprep.subr.bf16.mxu0 %v2609_v59  ;;  %v2644_v59 = vld [vmem:[#allocation4 + $0x18] sm:$0xff]  }
  0x6c   :  { %2307 = vmatpush3.bf16.msra.mxu1 %v2600_v60 }
  0x6d   :  { %2308 = vmatprep.subr.bf16.mxu1 %v2601_v61  ;;  %v2647_v61 = vld [vmem:[#allocation4 + $0x60] sm:$0xff]  }
  0x6e   :  { %2323 = vmatpush3.bf16.msra.mxu0 %v2610_v62  ;;  %v2626_v62 = vld [vmem:[#allocation6 + $0x128] sm:$0xff]  }
  0x6f   :  { %2324 = vmatprep.subr.bf16.mxu0 %v2612_v63  ;;  %v2167_v63 = vld [vmem:[%s3049_s4 + $0x4] ss:$0 sm:$0xff] }
  0x70   :  { %2309 = vmatpush3.bf16.msra.mxu1 %v2602_v0  ;;  %v2648_v0 = vld [vmem:[#allocation4 + $0x20] sm:$0xff]  }
  0x71   :  { %2310 = vmatprep.subr.bf16.mxu1 %v2603_v1 }
  0x72   :  { %2325 = vmatpush3.bf16.msra.mxu0 %v2613_v2  ;;  %v2651_v2 = vld [vmem:[#allocation4 + $0x68] sm:$0xff]  }
  0x73   :  { %2326 = vmatprep.subr.bf16.mxu0 %v2615_v3  ;;  %v2629_v3 = vld [vmem:[#allocation6 + $0x130] sm:$0xff]  }
  0x74   :  { %2311 = vmatpush3.bf16.msra.mxu1 %v2604_v4  ;;  %v2652_v4 = vld [vmem:[#allocation4 + $0x28] sm:$0xff]  }
  0x75   :  { %2312 = vmatprep.subr.bf16.mxu1 %v2605_v5 }
  0x76   :  { %2327 = vmatpush3.bf16.msra.mxu0 %v2616_v6  ;;  %v2655_v6 = vld [vmem:[#allocation4 + $0x70] sm:$0xff]  }
  0x77   :  { %2328 = vmatprep.subr.bf16.mxu0 %v2618_v7  ;;  %v2630_v7 = vld [vmem:[#allocation6 + $0x138] sm:$0xff]  }
  0x78   :  { %2313 = vmatpush3.bf16.msra.mxu1 %v2607_v8  ;;  %v2633_v8 = vld [vmem:[#allocation4 + $0xc0] sm:$0xff]  }
  0x79   :  { %2470 = vmatprep.subr.bf16.mxu1 %v2806_v11 }
  0x7a   :  { %2329 = vmatpush3.bf16.msra.mxu0 %v2619_v9  ;;  %v2656_v9 = vld [vmem:[#allocation4 + $0x30] sm:$0xff]  }
  0x7b   :  { %2330 = vmatprep.subr.bf16.mxu0 %v2621_v10 }
  0x7e   :  { %2331 = vmatpush3.bf16.msra.mxu0 %v2622_v12  ;;  %v2659_v12 = vld [vmem:[#allocation4 + $0x78] sm:$0xff]  }
  0x7f   :  { %2332 = vmatprep.subr.bf16.mxu0 %v2624_v13  ;;  %v2634_v13 = vld [vmem:[#allocation4 + $0x80] sm:$0xff]  }
  0x82   :  { %2333 = vmatpush3.bf16.msra.mxu0 %v2625_v14  ;;  %v2637_v14 = vld [vmem:[#allocation4 + $0xc8] sm:$0xff]  }
  0x83   :  { %2334 = vmatprep.subr.bf16.mxu0 %v2627_v15  ;;  %v2660_v15 = vld [vmem:[#allocation4 + $0x38] sm:$0xff]  }
  0x86   :  { %2335 = vmatpush3.bf16.msra.mxu0 %v2628_v16  ;;  %v2663_v16 = vld [vmem:[#allocation4 + $0x140] sm:$0xff]  }
  0x87   :  { %2351 = vmatprep.subr.bf16.mxu0 %v2631_v17  ;;  %v2638_v17 = vld [vmem:[#allocation4 + $0x88] sm:$0xff]  }
  0xbb   :  { %v613_v21 = vpop.permute.xlu0 %612  ;;  %v647_v24 = vpop.permute.xlu1 %646 }
  0xbc   :  { %v619_v22 = vmul.f32 %v2160_v18, %v613_v21  ;;  %v653_v26 = vmul.f32 %v2164_v19, %v647_v24  ;;  %v2641_v18 = vld [vmem:[#allocation4 + $0xd0] sm:$0xff]   ;;  %v2646_v21 = vld [vmem:[#allocation4 + $0x98] sm:$0xff]   ;;  %v2653_v24 = vld [vmem:[#allocation4 + $0xe8] sm:$0xff]  }
  0xbd   :  { %v2642_v19 = vld [vmem:[#allocation4 + $0x90] sm:$0xff]  }
  0xbe   :  { %v625_v27 = vadd.f32 %v2161_v20, %v619_v22  ;;  %v659_v29 = vadd.f32 %v2165_v23, %v653_v26  ;;  %v2645_v20 = vld [vmem:[#allocation4 + $0xd8] sm:$0xff]   ;;  %v2649_v22 = vld [vmem:[#allocation4 + $0xe0] sm:$0xff]   ;;  %v2657_v26 = vld [vmem:[#allocation4 + $0xf0] sm:$0xff]  }
  0xbf   :  { %v2650_v23 = vld [vmem:[#allocation4 + $0xa0] sm:$0xff]  }
  0xc0   :  { %v626_v30 = vmax.f32 %v625_v27, 0.0  ;;  %v596_v31 = vpop.permute.xlu0 %595  ;;  %v660_v33 = vmax.f32 %v659_v29, 0.0  ;;  %v630_v41 = vpop.permute.xlu1 %629  ;;  %v2658_v27 = vld [vmem:[#allocation4 + $0xb0] sm:$0xff]   ;;  %v2662_v29 = vld [vmem:[#allocation4 + $0xb8] sm:$0xff]  }
  0xc1   :  { %v602_v32 = vmul.f32 %v2158_v25, %v596_v31  ;;  %v636_v43 = vmul.f32 %v2162_v35, %v630_v41  ;;  %v2654_v25 = vld [vmem:[#allocation4 + $0xa8] sm:$0xff]   ;;  %v123_v31 = vlaneseq }
  0xc2   :  { %v679_v34 = vpack.c.bf16 %v626_v30, %v626_v30  ;;  %v681_v37 = vpack.c.bf16 %v660_v33, %v660_v33  ;;  %v2665_v30 = vld [vmem:[#allocation4 + $0x1c0] sm:$0xff]  }
  0xc3   :  { %v608_v36 = vadd.f32 %v2159_v28, %v602_v32  ;;  %v642_v45 = vadd.f32 %v2163_v39, %v636_v43  ;;  %v2661_v28 = vld [vmem:[#allocation4 + $0xf8] sm:$0xff]   ;;  %v2965_v32 = vshrl.u32 %v123_v31, 7  ;;  %v2680_v31 = vld [vmem:[#allocation4 + $0x120] sm:$0xff]  }
  0xc4   :  { %1205 = vmatprep.mubr.bf16.mxu1 %v679_v34  ;;  %1245 = vmatprep.mubr.bf16.mxu0 %v681_v37  ;;  %v2971_v34 = vld [vmem:[%s3047_s2] sm:$0xff] }
  0xc5   :  { %v609_v40 = vmax.f32 %v608_v36, 0.0  ;;  %v643_v46 = vmax.f32 %v642_v45, 0.0  ;;  %v125_v33 = vsub.s32 0, %v2965_v32  ;;  %v129_v35 = vsub.s32 1, %v2965_v32 }
  0xc6   :  { %v133_v36 = vsub.s32 2, %v2965_v32  ;;  %v137_v37 = vsub.s32 3, %v2965_v32 }
  0xc7   :  { %v678_v42 = vpack.c.bf16 %v609_v40, %v609_v40  ;;  %v680_v48 = vpack.c.bf16 %v643_v46, %v643_v46  ;;  %v664_v58 = vpop.permute.xlu1 %663  ;;  %v130_v39 = vrot.slane %v2971_v34, %v129_v35 }
  0xc8   :  { %v670_v60 = vmul.f32 %v2166_v57, %v664_v58  ;;  %v134_v40 = vrot.slane %v2971_v34, %v133_v36 }
  0xc9   :  { %1206 = vmatmul.mubr.bf16.vlgmr.msra.gmra.mrb[8].mxu1 %v678_v42  ;;  %1246 = vmatmul.mubr.bf16.vlgmr.msra.gmra.mrb[12].mxu0 %v680_v48  ;;  %v138_v42 = vrot.slane %v2971_v34, %v137_v37 }
  0xca   :  { %2471 = vmatpush3.bf16.msra.mxu1 %v2611_v38  ;;  %2486 = vmatprep.mubr.msk.bf16.mxu1 %vm2807_vm1, %v2806_v11  ;;  %v676_v1 = vadd.f32 %v2167_v63, %v670_v60  ;;  %v126_v38 = vrot.slane %v2971_v34, %v125_v33 }
  0xcb   :  { %2472 = vmatprep.subr.bf16.mxu1 %v2806_v11  ;;  %2352 = vmatpush3.bf16.msra.mxu0 %v2632_v47 }
  0xcc   :  { %2353 = vmatprep.subr.bf16.mxu0 %v2635_v49  ;;  %v677_v5 = vmax.f32 %v676_v1, 0.0  ;;  %v2669_v1 = vld [vmem:[#allocation4 + $0x1c8] sm:$0xff]  }
  0xce   :  { %2473 = vmatpush3.bf16.msra.mxu1 %v2614_v44  ;;  %v682_v10 = vpack.c.bf16 %v677_v5, %v677_v5  ;;  %v2670_v5 = vld [vmem:[#allocation4 + $0x188] sm:$0xff]  }
  0xcf   :  { %2474 = vmatprep.subr.bf16.mxu1 %v2806_v11  ;;  %2354 = vmatpush3.bf16.msra.mxu0 %v2636_v51 }
  0xd0   :  { %2355 = vmatprep.subr.bf16.mxu0 %v2639_v52 }
  0xd2   :  { %2475 = vmatpush3.bf16.msra.mxu1 %v2617_v50 }
  0xd3   :  { %2476 = vmatprep.subr.bf16.mxu1 %v2806_v11  ;;  %2356 = vmatpush3.bf16.msra.mxu0 %v2640_v54 }
  0xd4   :  { %2357 = vmatprep.subr.bf16.mxu0 %v2643_v55 }
  0xd6   :  { %2477 = vmatpush3.bf16.msra.mxu1 %v2620_v53 }
  0xd7   :  { %2478 = vmatprep.subr.bf16.mxu1 %v2806_v11  ;;  %2358 = vmatpush3.bf16.msra.mxu0 %v2644_v59  ;;  %v2664_v59 = vld [vmem:[#allocation4 + $0x100] sm:$0xff]  }
  0xd8   :  { %2359 = vmatprep.subr.bf16.mxu0 %v2647_v61 }
  0xda   :  { %2479 = vmatpush3.bf16.msra.mxu1 %v2623_v56 }
  0xdb   :  { %2480 = vmatprep.subr.bf16.mxu1 %v2806_v11  ;;  %2360 = vmatpush3.bf16.msra.mxu0 %v2648_v0  ;;  %v2666_v0 = vld [vmem:[#allocation4 + $0x180] sm:$0xff]  }
  0xdc   :  { %2361 = vmatprep.subr.bf16.mxu0 %v2651_v2  ;;  %v2668_v2 = vld [vmem:[#allocation4 + $0x108] sm:$0xff]  }
  0xde   :  { %2481 = vmatpush3.bf16.msra.mxu1 %v2626_v62  ;;  %v2667_v62 = vld [vmem:[#allocation4 + $0x148] sm:$0xff]  }
  0xdf   :  { %2482 = vmatprep.subr.bf16.mxu1 %v2806_v11  ;;  %2362 = vmatpush3.bf16.msra.mxu0 %v2652_v4  ;;  %v2671_v4 = vld [vmem:[#allocation4 + $0x150] sm:$0xff]  }
  0xe0   :  { %2363 = vmatprep.subr.bf16.mxu0 %v2655_v6  ;;  %v153_v6 = vsub.s32 7, %v2965_v32 }
  0xe2   :  { %2483 = vmatpush3.bf16.msra.mxu1 %v2629_v3  ;;  %v145_v3 = vsub.s32 5, %v2965_v32 }
  0xe3   :  { %2484 = vmatprep.subr.bf16.mxu1 %v2806_v11  ;;  %2364 = vmatpush3.bf16.msra.mxu0 %v2656_v9 }
  0xe4   :  { %2365 = vmatprep.subr.bf16.mxu0 %v2659_v12  ;;  %v146_v9 = vrot.slane %v2971_v34, %v145_v3  ;;  %v2674_v12 = vld [vmem:[#allocation4 + $0x190] sm:$0xff]   ;;  %v2696_v3 = vld [vmem:[#allocation4 + $0x200] sm:$0xff]  }
  0xe6   :  { %2485 = vmatpush3.bf16.msra.mxu1 %v2630_v7  ;;  %v2673_v7 = vld [vmem:[#allocation4 + $0x1d0] sm:$0xff]  }
  0xe7   :  { %2373 = vmatprep.subr.bf16.mxu1 %v2633_v8  ;;  %2366 = vmatpush3.bf16.msra.mxu0 %v2660_v15  ;;  %v2672_v8 = vld [vmem:[#allocation4 + $0x110] sm:$0xff]   ;;  %v2677_v15 = vld [vmem:[#allocation4 + $0x1d8] sm:$0xff]  }
  0xe8   :  { %2395 = vmatprep.subr.bf16.mxu0 %v2663_v16 }
  0xe9   :  { %2487 = vmatmul.mubr.bf16.vlgmr.msra.gmra.mrb[12].mxu1 %v682_v10  ;;  %v2675_v10 = vld [vmem:[#allocation4 + $0x158] sm:$0xff]  }
  0xea   :  { %2374 = vmatpush3.bf16.msra.mxu1 %v2634_v13 }
  0xeb   :  { %2375 = vmatprep.subr.bf16.mxu1 %v2637_v14  ;;  %v154_v14 = vrot.slane %v2971_v34, %v153_v6  ;;  %v2697_v6 = vld [vmem:[#allocation4 + $0x248] sm:$0xff]  }
  0xee   :  { %2376 = vmatpush3.bf16.msra.mxu1 %v2638_v17  ;;  %v2676_v17 = vld [vmem:[#allocation4 + $0x118] sm:$0xff]  }
  0xef   :  { %2377 = vmatprep.subr.bf16.mxu1 %v2641_v18 }
  0xf2   :  { %2378 = vmatpush3.bf16.msra.mxu1 %v2642_v19 }
  0xf3   :  { %2379 = vmatprep.subr.bf16.mxu1 %v2645_v20 }
  0xf6   :  { %2380 = vmatpush3.bf16.msra.mxu1 %v2646_v21  ;;  %v2679_v21 = vld [vmem:[#allocation4 + $0x160] sm:$0xff]  }
  0xf7   :  { %2381 = vmatprep.subr.bf16.mxu1 %v2649_v22 }
  0xfa   :  { %2382 = vmatpush3.bf16.msra.mxu1 %v2650_v23 }
  0xfb   :  { %2383 = vmatprep.subr.bf16.mxu1 %v2653_v24  ;;  %v2678_v24 = vld [vmem:[#allocation4 + $0x198] sm:$0xff]  }
  0xfe   :  { %2384 = vmatpush3.bf16.msra.mxu1 %v2654_v25 }
  0xff   :  { %2385 = vmatprep.subr.bf16.mxu1 %v2657_v26 }
 0x102   :  { %2386 = vmatpush3.bf16.msra.mxu1 %v2658_v27 }
 0x103   :  { %2387 = vmatprep.subr.bf16.mxu1 %v2661_v28  ;;  %v2681_v28 = vld [vmem:[#allocation4 + $0x1e0] sm:$0xff]  }
 0x106   :  { %2388 = vmatpush3.bf16.msra.mxu1 %v2662_v29  ;;  %v141_v29 = vsub.s32 4, %v2965_v32 }
 0x107   :  { %2417 = vmatprep.subr.bf16.mxu1 %v2665_v30 }
 0x11c   :  { %v411_v41 = vpop.f32.mrb[0].mxu0  ;;  %v452_v47 = vpop.f32.mrb[0].mxu1 }
 0x11d   :  { %v412_v43 = vadd.f32 %v411_v41, %v126_v38  ;;  %v413_v44 = vpop.f32.mrb[1].mxu0  ;;  %v453_v49 = vadd.f32 %v452_v47, %v134_v40  ;;  %v454_v51 = vpop.f32.mrb[1].mxu1  ;;  %v2683_v38 = vld [vmem:[#allocation4 + $0x168] sm:$0xff]   ;;  %v2682_v40 = vld [vmem:[#allocation4 + $0x1a0] sm:$0xff]  }
 0x11e   :  { %v414_v45 = vadd.f32 %v413_v44, %v130_v39  ;;  %v415_v46 = vpop.f32.mrb[2].mxu0  ;;  %v455_v53 = vadd.f32 %v454_v51, %v138_v42  ;;  %v456_v54 = vpop.f32.mrb[2].mxu1  ;;  %v149_v39 = vsub.s32 6, %v2965_v32  ;;  %v142_v42 = vrot.slane %v2971_v34, %v141_v29  ;;  %v2684_v44 = vld [vmem:[#allocation4 + $0x128] sm:$0xff]   ;;  %v2713_v29 = vld [vmem:[%s3053_s8 + $0x10] sm:$0xff]  }
 0x11f   :  { %v582_v48 = vmax.f32 %v412_v43, 0.0  ;;  %v416_v50 = vpop.f32.mrb[3].mxu0  ;;  %v584_v55 = vmax.f32 %v453_v49, 0.0  ;;  %v457_v56 = vpop.f32.mrb[3].mxu1  ;;  %v2685_v43 = vld [vmem:[#allocation4 + $0x1e8] sm:$0xff]   ;;  %v2687_v46 = vld [vmem:[#allocation4 + $0x170] sm:$0xff]  }
 0x120   :  { %v583_v52 = vmax.f32 %v414_v45, 0.0  ;;  %v585_v58 = vmax.f32 %v455_v53, 0.0  ;;  %v120_v45 = vld [vmem:[%s3047_s2 + $0x8] sm:$0x3]  ;;  %v150_v47 = vrot.slane %v2971_v34, %v149_v39  ;;  %v2689_v50 = vld [vmem:[#allocation4 + $0x1f0] sm:$0xff]  }
 0x121   :  { %v683_v60 = vpack.c.bf16 %v582_v48, %v582_v48  ;;  %v685_v61 = vpack.c.bf16 %v584_v55, %v584_v55  ;;  %v2686_v48 = vld [vmem:[#allocation4 + $0x1a8] sm:$0xff]   ;;  %v158_v51 = vrot.slane %v120_v45, %v125_v33  ;;  %v162_v53 = vrot.slane %v120_v45, %v129_v35  ;;  %v2691_v55 = vld [vmem:[#allocation4 + $0x178] sm:$0xff]   ;;  %v2690_v56 = vld [vmem:[#allocation4 + $0x1b0] sm:$0xff]  }
 0x122   :  { %v684_v57 = vpack.c.bf16 %v583_v52, %v583_v52  ;;  %v686_v63 = vpack.c.bf16 %v585_v58, %v585_v58  ;;  %v2688_v52 = vld [vmem:[#allocation4 + $0x130] sm:$0xff]   ;;  %v2693_v58 = vld [vmem:[#allocation4 + $0x1f8] sm:$0xff]  }
 0x123   :  { %v2694_v35 = vld [vmem:[#allocation4 + $0x1b8] sm:$0xff]  }
 0x124   :  { %1805 = vmatprep.mubr.bf16.mxu0 %v684_v57  ;;  %1845 = vmatprep.mubr.bf16.mxu1 %v686_v63  ;;  %v2718_v45 = vld [vmem:[%s3053_s8 + $0x38] sm:$0xff]  }
 0x125   :  { %1806 = vmatmul.mubr.bf16.vlgmr.msra.gmra.mrb[16].mxu0 %v683_v60  ;;  %1846 = vmatmul.mubr.bf16.vlgmr.msra.gmra.mrb[16].mxu1 %v685_v61  ;;  %v2692_v61 = vld [vmem:[#allocation4 + $0x138] sm:$0xff]  }
 0x126   :  { %2396 = vmatpush3.bf16.msra.mxu0 %v2664_v59  ;;  %2418 = vmatpush3.bf16.msra.mxu1 %v2666_v0  ;;  %v2695_v0 = vld [vmem:[#allocation4 + $0x240] sm:$0xff]  }
 0x127   :  { %2397 = vmatprep.subr.bf16.mxu0 %v2667_v62  ;;  %2419 = vmatprep.subr.bf16.mxu1 %v2669_v1 }
 0x12a   :  { %2398 = vmatpush3.bf16.msra.mxu0 %v2668_v2  ;;  %2420 = vmatpush3.bf16.msra.mxu1 %v2670_v5 }
 0x12b   :  { %2399 = vmatprep.subr.bf16.mxu0 %v2671_v4  ;;  %2421 = vmatprep.subr.bf16.mxu1 %v2673_v7  ;;  %v2698_v7 = vld [vmem:[#allocation4 + $0x208] sm:$0xff]  }
 0x12c   :  { %v493_v13 = vpop.f32.mrb[4].mxu0 }
 0x12d   :  { %v495_v16 = vpop.f32.mrb[5].mxu0  ;;  %v494_v49 = vadd.f32 %v493_v13, %v142_v42  ;;  %v2703_v13 = vld [vmem:[#allocation4 + $0x260] sm:$0xff]  }
 0x12e   :  { %2400 = vmatpush3.bf16.msra.mxu0 %v2672_v8  ;;  %v496_v18 = vadd.f32 %v495_v16, %v146_v9  ;;  %v497_v19 = vpop.f32.mrb[6].mxu0  ;;  %v534_v20 = vpop.f32.mrb[4].mxu1  ;;  %2422 = vmatpush3.bf16.msra.mxu1 %v2674_v12  ;;  %v2699_v8 = vld [vmem:[#allocation4 + $0x250] sm:$0xff]   ;;  %v2702_v12 = vld [vmem:[#allocation4 + $0x218] sm:$0xff]   ;;  %v2706_v16 = vld [vmem:[#allocation4 + $0x228] sm:$0xff]  }
 0x12f   :  { %2401 = vmatprep.subr.bf16.mxu0 %v2675_v10  ;;  %v498_v22 = vpop.f32.mrb[7].mxu0  ;;  %v536_v23 = vpop.f32.mrb[5].mxu1  ;;  %2423 = vmatprep.subr.bf16.mxu1 %v2677_v15  ;;  %v535_v54 = vadd.f32 %v534_v20, %v150_v47  ;;  %v586_v34 = vmax.f32 %v494_v49, 0.0  ;;  %v2700_v9 = vld [vmem:[#allocation4 + $0x210] sm:$0xff]   ;;  %v2701_v10 = vld [vmem:[#allocation4 + $0x258] sm:$0xff]   ;;  %v2705_v15 = vld [vmem:[#allocation4 + $0x268] sm:$0xff]  }
 0x130   :  { %v587_v25 = vmax.f32 %v496_v18, 0.0  ;;  %v537_v26 = vadd.f32 %v536_v23, %v154_v14  ;;  %v538_v27 = vpop.f32.mrb[6].mxu1  ;;  %v2704_v14 = vld [vmem:[#allocation4 + $0x220] sm:$0xff]   ;;  %v2708_v18 = vld [vmem:[#allocation4 + $0x230] sm:$0xff]   ;;  %v2709_v19 = vld [vmem:[#allocation4 + $0x278] sm:$0xff]  }
 0x131   :  { %v539_v30 = vpop.f32.mrb[7].mxu1  ;;  %v588_v63 = vmax.f32 %v535_v54, 0.0  ;;  %v687_v2 = vpack.c.bf16 %v586_v34, %v586_v34  ;;  %v2710_v20 = vld [vmem:[#allocation4 + $0x238] sm:$0xff]   ;;  %v2711_v23 = vld [vmem:[%s3053_s8] sm:$0xff]  }
 0x132   :  { %2402 = vmatpush3.bf16.msra.mxu0 %v2676_v17  ;;  %v688_v36 = vpack.c.bf16 %v587_v25, %v587_v25  ;;  %v589_v37 = vmax.f32 %v537_v26, 0.0  ;;  %2424 = vmatpush3.bf16.msra.mxu1 %v2678_v24  ;;  %v2707_v17 = vld [vmem:[#allocation4 + $0x270] sm:$0xff]   ;;  %v2712_v24 = vld [vmem:[%s3053_s8 + $0x8] sm:$0xff]   ;;  %v2715_v42 = vld [vmem:[%s3053_s8 + $0x20] sm:$0xff]  }
 0x133   :  { %2403 = vmatprep.subr.bf16.mxu0 %v2679_v21  ;;  %2425 = vmatprep.subr.bf16.mxu1 %v2681_v28  ;;  %v689_v5 = vpack.c.bf16 %v588_v63, %v588_v63 }
 0x134   :  { %v690_v41 = vpack.c.bf16 %v589_v37, %v589_v37  ;;  %1885 = vmatprep.mubr.bf16.mxu0 %v688_v36  ;;  %v2714_v36 = vld [vmem:[%s3053_s8 + $0x18] sm:$0xff]  }
 0x136   :  { %2404 = vmatpush3.bf16.msra.mxu0 %v2680_v31  ;;  %1925 = vmatprep.mubr.bf16.mxu1 %v690_v41 }
 0x137   :  { %2405 = vmatprep.subr.bf16.mxu0 %v2683_v38  ;;  %2426 = vmatpush3.bf16.msra.mxu1 %v2682_v40 }
 0x138   :  { %2427 = vmatprep.subr.bf16.mxu1 %v2685_v43  ;;  %v2716_v43 = vld [vmem:[%s3053_s8 + $0x28] sm:$0xff]  }
 0x13a   :  { %2406 = vmatpush3.bf16.msra.mxu0 %v2684_v44  ;;  %v2717_v44 = vld [vmem:[%s3053_s8 + $0x30] sm:$0xff]  }
 0x13b   :  { %2407 = vmatprep.subr.bf16.mxu0 %v2687_v46  ;;  %2428 = vmatpush3.bf16.msra.mxu1 %v2686_v48 }
 0x13c   :  { %v575_v57 = vpop.f32.mrb[8].mxu0  ;;  %2429 = vmatprep.subr.bf16.mxu1 %v2689_v50 }
 0x13d   :  { %v576_v59 = vadd.f32 %v575_v57, %v158_v51  ;;  %v577_v60 = vpop.f32.mrb[9].mxu0 }
 0x13e   :  { %2408 = vmatpush3.bf16.msra.mxu0 %v2688_v52  ;;  %v578_v62 = vadd.f32 %v577_v60, %v162_v53  ;;  %v579_v33 = vpop.f32.mrb[10].mxu0 }
 0x13f   :  { %2409 = vmatprep.subr.bf16.mxu0 %v2691_v55  ;;  %v580_v32 = vpop.f32.mrb[11].mxu0  ;;  %2430 = vmatpush3.bf16.msra.mxu1 %v2690_v56  ;;  %v590_v21 = vmax.f32 %v576_v59, 0.0 }
 0x140   :  { %v591_v1 = vmax.f32 %v578_v62, 0.0  ;;  %2431 = vmatprep.subr.bf16.mxu1 %v2693_v58 }
 0x141   :  { %v691_v22 = vpack.c.bf16 %v590_v21, %v590_v21 }
 0x142   :  { %2410 = vmatpush3.bf16.msra.mxu0 %v2692_v61  ;;  %v692_v4 = vpack.c.bf16 %v591_v1, %v591_v1 }
 0x143   :  { %2439 = vmatprep.subr.bf16.mxu0 %v2695_v0  ;;  %2432 = vmatpush3.bf16.msra.mxu1 %v2694_v35 }
 0x144   :  { %2490 = vmatprep.subr.bf16.mxu1 %v2806_v11 }
 0x145   :  { %1886 = vmatmul.mubr.bf16.vlgmr.msra.gmra.mrb[20].mxu0 %v687_v2 }
 0x146   :  { %2440 = vmatpush3.bf16.msra.mxu0 %v2696_v3  ;;  %1965 = vmatprep.mubr.bf16.mxu0 %v692_v4 }
 0x147   :  { %1926 = vmatmul.mubr.bf16.vlgmr.msra.gmra.mrb[20].mxu1 %v689_v5  ;;  %2441 = vmatprep.subr.bf16.mxu0 %v2697_v6 }
 0x148   :  { %2506 = vmatprep.mubr.msk.bf16.mxu1 %vm2807_vm1, %v2806_v11  ;;  %2491 = vmatpush3.bf16.msra.mxu1 %v2711_v23 }
 0x149   :  { %2492 = vmatprep.subr.bf16.mxu1 %v2806_v11 }
 0x14a   :  { %2442 = vmatpush3.bf16.msra.mxu0 %v2698_v7 }
 0x14b   :  { %2443 = vmatprep.subr.bf16.mxu0 %v2699_v8 }
 0x14c   :  { %2493 = vmatpush3.bf16.msra.mxu1 %v2712_v24 }
 0x14d   :  { %2494 = vmatprep.subr.bf16.mxu1 %v2806_v11 }
 0x14e   :  { %2444 = vmatpush3.bf16.msra.mxu0 %v2700_v9 }
 0x14f   :  { %2445 = vmatprep.subr.bf16.mxu0 %v2701_v10  ;;  %v2288_v10 = vld [vmem:[%s3052_s7] ss:$0 sm:$0xff] }
 0x150   :  { %2495 = vmatpush3.bf16.msra.mxu1 %v2713_v29 }
 0x151   :  { %2496 = vmatprep.subr.bf16.mxu1 %v2806_v11 }
 0x152   :  { %2446 = vmatpush3.bf16.msra.mxu0 %v2702_v12 }
 0x153   :  { %2447 = vmatprep.subr.bf16.mxu0 %v2703_v13 }
 0x154   :  { %2497 = vmatpush3.bf16.msra.mxu1 %v2714_v36 }
 0x155   :  { %2498 = vmatprep.subr.bf16.mxu1 %v2806_v11 }
 0x156   :  { %2448 = vmatpush3.bf16.msra.mxu0 %v2704_v14 }
 0x157   :  { %2449 = vmatprep.subr.bf16.mxu0 %v2705_v15 }
 0x158   :  { %2499 = vmatpush3.bf16.msra.mxu1 %v2715_v42 }
 0x159   :  { %2500 = vmatprep.subr.bf16.mxu1 %v2806_v11 }
 0x15a   :  { %2450 = vmatpush3.bf16.msra.mxu0 %v2706_v16 }
 0x15b   :  { %2451 = vmatprep.subr.bf16.mxu0 %v2707_v17  ;;  %v2289_v17 = vld [vmem:[%s3054_s9] ss:$0 sm:$0xff] }
 0x15c   :  { %2501 = vmatpush3.bf16.msra.mxu1 %v2716_v43 }
 0x15d   :  { %2502 = vmatprep.subr.bf16.mxu1 %v2806_v11 }
 0x15e   :  { %2452 = vmatpush3.bf16.msra.mxu0 %v2708_v18 }
 0x15f   :  { %2453 = vmatprep.subr.bf16.mxu0 %v2709_v19 }
 0x160   :  { %2503 = vmatpush3.bf16.msra.mxu1 %v2717_v44 }
 0x161   :  { %2504 = vmatprep.subr.bf16.mxu1 %v2806_v11 }
 0x162   :  { %2454 = vmatpush3.bf16.msra.mxu0 %v2710_v20 }
 0x164   :  { %2505 = vmatpush3.bf16.msra.mxu1 %v2718_v45 }
 0x165   :  { %1966 = vmatmul.mubr.bf16.vlgmr.msra.gmra.mrb[24].mxu0 %v691_v22 }
 0x19c   :  { %v2314_v25 = vpop.f32.mrb[8].mxu1  ;;  %v2336_v31 = vpop.f32.mrb[12].mxu0 }
 0x19d   :  { %v2315_v26 = vpop.f32.mrb[9].mxu1  ;;  %v2337_v37 = vpop.f32.mrb[13].mxu0 }
 0x19e   :  { %v2316_v27 = vadd.f32 %v2315_v26, %v2314_v25  ;;  %v2317_v28 = vpop.f32.mrb[10].mxu1  ;;  %v2338_v38 = vadd.f32 %v2337_v37, %v2336_v31  ;;  %v2339_v39 = vpop.f32.mrb[14].mxu0 }
 0x19f   :  { %v2318_v30 = vpop.f32.mrb[11].mxu1  ;;  %v2340_v40 = vpop.f32.mrb[15].mxu0 }
 0x1a0   :  { %v1248_v41 = vadd.f32 %v2338_v38, %v2316_v27 }
 0x1bc   :  { %v1287_v46 = vpop.f32.mrb[12].mxu1 }
 0x1bd   :  { %v1288_v47 = vadd.f32 %v1287_v46, %v1248_v41  ;;  %v2488_v48 = vpop.f32.mrb[13].mxu1 }
 0x1be   :  { %v1290_v49 = vpop.f32.mrb[14].mxu1 }
 0x1bf   :  { %v2489_v50 = vpop.f32.mrb[15].mxu1 }
 0x1f8   :  { %v2367_v51 = vpop.f32.mrb[16].mxu0  ;;  %v2389_v55 = vpop.f32.mrb[16].mxu1 }
 0x1f9   :  { %v2368_v52 = vpop.f32.mrb[17].mxu0  ;;  %v2390_v57 = vpop.f32.mrb[17].mxu1 }
 0x1fa   :  { %v2369_v53 = vadd.f32 %v2368_v52, %v2367_v51  ;;  %v2370_v54 = vpop.f32.mrb[18].mxu0  ;;  %v2391_v58 = vadd.f32 %v2390_v57, %v2389_v55  ;;  %v2392_v11 = vpop.f32.mrb[18].mxu1 }
 0x1fb   :  { %v2371_v56 = vpop.f32.mrb[19].mxu0  ;;  %v2393_v59 = vpop.f32.mrb[19].mxu1 }
 0x1fc   :  { %v1808_v34 = vadd.f32 %v2369_v53, %v1288_v47 }
 0x1fe   :  { %v1848_v60 = vadd.f32 %v2391_v58, %v1808_v34 }
 0x218   :  { %v2411_v61 = vpop.f32.mrb[20].mxu0 }
 0x219   :  { %v2412_v62 = vpop.f32.mrb[21].mxu0 }
 0x21a   :  { %v2413_v33 = vadd.f32 %v2412_v62, %v2411_v61  ;;  %v2414_v63 = vpop.f32.mrb[22].mxu0  ;;  %v2433_v0 = vpop.f32.mrb[20].mxu1 }
 0x21b   :  { %v2415_v32 = vpop.f32.mrb[23].mxu0  ;;  %v2434_v35 = vpop.f32.mrb[21].mxu1 }
 0x21c   :  { %v1888_v1 = vadd.f32 %v2413_v33, %v1848_v60  ;;  %v2435_v2 = vadd.f32 %v2434_v35, %v2433_v0  ;;  %v2436_v3 = vpop.f32.mrb[22].mxu1 }
 0x21d   :  { %v2437_v4 = vpop.f32.mrb[23].mxu1 }
 0x21e   :  { %v1928_v5 = vadd.f32 %v2435_v2, %v1888_v1 }
 0x238   :  { %v2455_v6 = vpop.f32.mrb[24].mxu0 }
 0x239   :  { %v2456_v7 = vpop.f32.mrb[25].mxu0 }
 0x23a   :  { %v2457_v8 = vadd.f32 %v2456_v7, %v2455_v6  ;;  %v2458_v9 = vpop.f32.mrb[26].mxu0 }
 0x23b   :  { %v2459_v12 = vpop.f32.mrb[27].mxu0 }
 0x23c   :  { %v1968_v13 = vadd.f32 %v2457_v8, %v1928_v5 }
 0x23e   :  { %v1980_v14 = vadd.f32 %v2288_v10, %v1968_v13 }
 0x240   :  { %v1981_v15 = vmax.f32 %v1980_v14, 0.0 }
 0x242   :  { %v1982_v16 = vpack.c.bf16 %v1981_v15, %v1981_v15 }
 0x244   :  { %2507 = vmatmul.mubr.bf16.vlgmr.msra.gmra.mrb[24].mxu1 %v1982_v16 }
 0x317   :  { %v2088_v18 = vpop.f32.mrb[24].mxu1 }
 0x318   :  { %v2089_v19 = vadd.f32 %v2289_v17, %v2088_v18  ;;  %v2508_v20 = vpop.f32.mrb[25].mxu1 }
 0x319   :  { %v2091_v21 = vpop.f32.mrb[26].mxu1 }
 0x31a   :  { %v2509_v22 = vpop.f32.mrb[27].mxu1  ;;  %v2095_v23 = vsel %vm2094_vm2, %v2089_v19, -inf }
 0x31b   :  { %2096 = vmax.xlane.f32.xlu0 %v2095_v23 }
 0x3a8   :  { %v2097_v24 = vpop.xlane.xlu0 %2096 }
 0x3a9   :  { %v2098_v25 = vsub.f32 %v2089_v19, %v2097_v24 }
 0x3ab   :  { %v2099_v26 = vmul.f32 1.442695, %v2098_v25 }
 0x3ad   :  { %2719 = vpow2.f32 %v2099_v26 }
 0x3b7   :  { %v2720_v27 = vpop.eup %2719 }
 0x3b8   :  { %v2101_v28 = vsel %vm2094_vm2, %v2720_v27, 0.0 }
 0x3b9   :  { %2102 = vadd.xlane.f32.xlu1 %v2101_v28 }
 0x446   :  { %v2103_v29 = vpop.xlane.xlu1 %2102 }
 0x447   :  { %2721 = vrcp.f32 %v2103_v29 }
 0x451   :  { %v2722_v30 = vpop.eup %2721 }
 0x452   :  { %v2105_v31 = vmul.f32 %v2722_v30, %v2720_v27 }
 0x454   :  { %2106 = vst.msk [vmem:[%s3055_s10] sm:$0xff] %vm2094_vm2, %v2105_v31 }
 0x455   :  { %2111 = vsyncpa [#allocation3], 1 }
 0x456   :  { %2112 = vsyncpa [#allocation5], 1 }

</bundles_post_ra>
